<compile_context>
chip_gen: v6e
topology: v6e:2x2x1
jax: 0.10.0
libtpu: 0.0.40
codegen_flags: <defaults>
</compile_context>

<pallas_src>
import numpy as np
import jax
import jax.numpy as jnp
from jax import lax
from jax.experimental import pallas as pl
from jax.experimental.pallas import tpu as pltpu


def get_frequency_modes(seq_len, modes=4, mode_select_method='random'):
    modes = min(modes, seq_len // 2)
    if mode_select_method == 'random':
        index = list(range(0, seq_len // 2))
        rng = np.random.RandomState(0)   # deterministic shuffle (synthetic init)
        rng.shuffle(index)
        index = index[:modes]
    else:
        index = list(range(0, modes))
    index.sort()
    return index


def _fourier_block_kernel(x_ref, w_ref, o_ref):
    """One batched matmul over a block of (node, mode) pairs.

    x_ref: (G, B, 2D)   columns = [Re(x) | Im(x)] of the selected spectrum
    w_ref: (G, 2D, 2O)  real-isomorphism weights [[wr, wi], [-wi, wr]]
    o_ref: (G, B, 2O)   columns = [Re(out) | Im(out)]
    """
    o_ref[...] = lax.dot_general(
        x_ref[...], w_ref[...],
        dimension_numbers=(((2,), (1,)), ((0,), (0,))),
        preferred_element_type=jnp.float32,
    ).astype(o_ref.dtype)


def pack_fourier_weights(weights_r, weights_i, dtype=jnp.float32):
    """(N, D, O, M) real/imag -> (N*M, 2D, 2O) real-isomorphism weights.

    Per (node, mode):  W2 = [[wr, wi], [-wi, wr]]  so that
    [xr | xi] @ W2 = [xr*wr - xi*wi | xr*wi + xi*wr] = [Re | Im].
    Done once at init time (hoisted out of the forward path).
    Pass dtype=jnp.bfloat16 for ~2x less weight bandwidth (looser tolerance).
    """
    N, D, O, M = weights_r.shape
    wr = jnp.transpose(weights_r, (0, 3, 1, 2))        # (N, M, D, O)
    wi = jnp.transpose(weights_i, (0, 3, 1, 2))
    top = jnp.concatenate([wr, wi], axis=-1)           # (N, M, D, 2O)
    bot = jnp.concatenate([-wi, wr], axis=-1)          # (N, M, D, 2O)
    w2 = jnp.concatenate([top, bot], axis=-2)          # (N, M, 2D, 2O)
    return w2.reshape(N * M, 2 * D, 2 * O).astype(dtype)


def fourier_block_forward(q, w_packed, index, group=None):
    """q: (B, D, N, L) float32.  w_packed: (N*M, 2D, 2O) from pack_fourier_weights."""
    B, D, N, L = q.shape
    M = len(index)
    NM, twoD, twoO = w_packed.shape
    assert NM == N * M and twoD == 2 * D
    O = twoO // 2
    H = L // 2 + 1

    # ---- plain-JAX glue: rfft + mode gather + [Re | Im] packing ----------------
    x = jnp.transpose(q, (0, 2, 1, 3)).astype(jnp.float32)     # (B, N, D, L)
    x_ft = jnp.fft.rfft(x, axis=-1)                            # (B, N, D, H) c64

    idx = jnp.asarray(index, dtype=jnp.int32)
    x_sel = jnp.take(x_ft, idx, axis=-1)                       # (B, N, D, M)
    x_ri = jnp.stack([jnp.real(x_sel), jnp.imag(x_sel)], axis=2)   # (B, N, 2, D, M)
    x_pack = jnp.transpose(x_ri, (1, 4, 0, 2, 3))              # (N, M, B, 2, D)
    x_pack = x_pack.reshape(NM, B, twoD).astype(w_packed.dtype)

    # ---- Pallas: batched (B, 2D) x (2D, 2O) matmul over (node, mode) pairs -----
    if group is None:
        # One step when everything fits comfortably; otherwise cap the per-step
        # block so double-buffered (x + w + out) stays well below the default
        # scoped VMEM limit (16/32/32 MiB on v5e/v6e/v7x).  Raise vmem_limit_bytes
        # in CompilerParams if you enlarge this.
        bytes_per_pair = w_packed.dtype.itemsize * (B * twoD + twoD * twoO + B * twoO)
        group = max(1, min(NM, (4 * 1024 * 1024) // max(bytes_per_pair, 1)))
    group = min(group, NM)
    n_steps = pl.cdiv(NM, group)

    out = pl.pallas_call(
        _fourier_block_kernel,
        out_shape=jax.ShapeDtypeStruct((NM, B, twoO), jnp.float32),
        grid=(n_steps,),
        in_specs=[pl.BlockSpec((group, B, twoD), lambda g: (g, 0, 0)),
                  pl.BlockSpec((group, twoD, twoO), lambda g: (g, 0, 0))],
        out_specs=pl.BlockSpec((group, B, twoO), lambda g: (g, 0, 0)),
        compiler_params=pltpu.CompilerParams(
            dimension_semantics=("parallel",)),    # v7x megacore shards the steps
    )(x_pack, w_packed)

    # ---- plain-JAX glue: reassemble complex spectrum, scatter, irfft -----------
    out = out.reshape(N, M, B, twoO)
    out_c = (out[..., :O] + 1j * out[..., O:]).astype(jnp.complex64)   # (N, M, B, O)
    out_c = jnp.transpose(out_c, (2, 0, 3, 1))                         # (B, N, O, M)

    # NOTE: the PyTorch loop writes mode `wi` into slot wi (0..modes-1), NOT at its
    # frequency index `i`; this intentionally reproduces that quirk.
    out_ft = jnp.zeros((B, N, O, H), dtype=jnp.complex64)
    out_ft = out_ft.at[..., :M].set(out_c)

    output = jnp.fft.irfft(out_ft, n=L, axis=-1)                       # (B, N, O, L)
    output = jnp.transpose(output, (0, 2, 1, 3))                       # (B, O, N, L)
    return output, None


if __name__ == "__main__":
    # module-implied shapes: q is (B, in_channels, node, seq_len)
    B, D, N, L = 2, 4, 3, 16
    O = D                    # out_channels == in_channels (required by out_ft shape)
    modes = 4
    index = get_frequency_modes(L, modes=modes, mode_select_method='random')

    key = jax.random.PRNGKey(0)
    kq, kwr, kwi = jax.random.split(key, 3)
    q = jax.random.normal(kq, (B, D, N, L), dtype=jnp.float32)

    # weights1 = scale * rand(node, in_ch, out_ch, len(index)) complex
    scale = 1.0 / (D * O)
    weights_r = scale * jax.random.uniform(kwr, (N, D, O, len(index)), dtype=jnp.float32)
    weights_i = scale * jax.random.uniform(kwi, (N, D, O, len(index)), dtype=jnp.float32)

    # layout hoist: pack the real-isomorphism weights once at "init" time
    w_packed = jax.block_until_ready(pack_fourier_weights(weights_r, weights_i))

    out, aux = fourier_block_forward(q, w_packed, index)
    out = jax.block_until_ready(out)
    assert out.shape == (B, O, N, L) and aux is None

    # pure-JAX reference of the PyTorch forward
    x = jnp.transpose(q, (0, 2, 1, 3))
    x_ft = jnp.fft.rfft(x, axis=-1)
    w = (weights_r + 1j * weights_i).astype(jnp.complex64)
    out_ft = jnp.zeros((B, N, O, L // 2 + 1), dtype=jnp.complex64)
    for wi_, i in enumerate(index):
        out_ft = out_ft.at[:, :, :, wi_].set(
            jnp.einsum('bhi,hio->bho', x_ft[:, :, :, i], w[:, :, :, wi_]))
    ref = jnp.transpose(jnp.fft.irfft(out_ft, n=L, axis=-1), (0, 2, 1, 3))

    assert jnp.allclose(out, ref, atol=1e-4, rtol=1e-4), "mismatch vs reference"
    print("KERNEL_OK")
</pallas_src>

<mosaic_0001>
module attributes {stable_mosaic.version = 11 : i64} {
  func.func @_fourier_block_kernel(%arg0: i32, %arg1: memref<12x2x8xf32, #tpu.memory_space<vmem>>, %arg2: memref<12x8x8xf32, #tpu.memory_space<vmem>>, %arg3: memref<12x2x8xf32, #tpu.memory_space<vmem>>) attributes {dimension_semantics = [#tpu.dimension_semantics<parallel>], iteration_bounds = array<i64: 1>, scalar_prefetch = 0 : i64, scratch_operands = 0 : i64, tpu.core_type = #tpu.core_type<tc>, window_params = [{transform_indices = @transform_0, window_bounds = array<i64: 12, 2, 8>}, {transform_indices = @transform_1, window_bounds = array<i64: 12, 8, 8>}, {transform_indices = @transform_2, window_bounds = array<i64: 12, 2, 8>}]} {
    %c0 = arith.constant 0 : index
    %c0_0 = arith.constant 0 : index
    %c0_1 = arith.constant 0 : index
    %0 = vector.load %arg1[%c0, %c0_0, %c0_1] : memref<12x2x8xf32, #tpu.memory_space<vmem>>, vector<12x2x8xf32>
    %c0_2 = arith.constant 0 : index
    %c0_3 = arith.constant 0 : index
    %c0_4 = arith.constant 0 : index
    %1 = vector.load %arg2[%c0_2, %c0_3, %c0_4] : memref<12x8x8xf32, #tpu.memory_space<vmem>>, vector<12x8x8xf32>
    %cst = arith.constant dense<0.000000e+00> : vector<12x2x8xf32>
    %2 = tpu.matmul %0, %1, %cst {dimension_numbers = #tpu.dot_dimension_numbers<[2], [1], [1], [2], [0, 0, 0, 1, 1, 2], [0], [0]>} : vector<12x2x8xf32>, vector<12x8x8xf32>, vector<12x2x8xf32> -> vector<12x2x8xf32>
    %c0_5 = arith.constant 0 : index
    %c0_6 = arith.constant 0 : index
    %c0_7 = arith.constant 0 : index
    %3 = vector.load %arg3[%c0_5, %c0_6, %c0_7] : memref<12x2x8xf32, #tpu.memory_space<vmem>>, vector<12x2x8xf32>
    tpu.vector_store %arg3[%c0_5, %c0_6, %c0_7], %2 {strides = array<i32>} : memref<12x2x8xf32, #tpu.memory_space<vmem>>, vector<12x2x8xf32>,
    return
  }
  func.func @transform_0(%arg0: i32) -> (i32, i32, i32) {
    %c0_i32 = arith.constant 0 : i32
    %c0_i32_0 = arith.constant 0 : i32
    %c0_i32_1 = arith.constant 0 : i32
    return %arg0, %c0_i32, %c0_i32_0 : i32, i32, i32
  }
  func.func @transform_1(%arg0: i32) -> (i32, i32, i32) {
    %c0_i32 = arith.constant 0 : i32
    %c0_i32_0 = arith.constant 0 : i32
    %c0_i32_1 = arith.constant 0 : i32
    return %arg0, %c0_i32, %c0_i32_0 : i32, i32, i32
  }
  func.func @transform_2(%arg0: i32) -> (i32, i32, i32) {
    %c0_i32 = arith.constant 0 : i32
    %c0_i32_0 = arith.constant 0 : i32
    %c0_i32_1 = arith.constant 0 : i32
    return %arg0, %c0_i32, %c0_i32_0 : i32, i32, i32
  }
}

</mosaic_0001>

<bundles_post_ra>
// kernel: tpu_custom_call.1
= control target key start
LH: loop header
LB: loop body
LE: loop exit
PB: predicated region body
PF: predicated region fallthrough
CT: control target
= control target key end

     0   :  { %v1027_v0 = vmov 0.0   ;;  %vm35_vm0 = vcmask 64512   ;;  %vm1028_vm1 = vmmov 0   ;;  %vm912_vm2 = vcmask 58368   ;;  %s1212_s1 = inlined_call_operand.vmem [shape: f32[12,8,8], index: 1, kind: input, shape index: {}]   ;;  %s1213_s0 = inlined_call_operand.vmem [shape: f32[12,2,8], index: 0, kind: input, shape index: {}]   ;;  %s1214_s2 = inlined_call_operand.vmem [shape: f32[12,2,8], index: 2, kind: output, shape index: {}]  }
   0x1   :  { %965 = vmatprep.subr.mxu0 %v1027_v0  ;;  %970 = vmatprep.subr.mxu1 %v1027_v0  ;;  %v23_v1 = vld [vmem:[%s1212_s1] sm:$0xff]  ;;  %v24_v2 = vld [vmem:[%s1212_s1 + $0x8] sm:$0xff]  ;;  %v25_v5 = vld [vmem:[%s1212_s1 + $0x10] sm:$0xff] }
   0x2   :  { %v11_v3 = vld [vmem:[%s1213_s0] sm:$0x3]  ;;  %966 = vmatpush3.msra.mxu0 %v23_v1  ;;  %967 = vmatprep.mubr.msk.f32.mxu0 %vm1028_vm1, %v1027_v0  ;;  %v12_v4 = vld [vmem:[%s1213_s0 + $0x2] sm:$0x3]  ;;  %v26_v6 = vld [vmem:[%s1212_s1 + $0x18] sm:$0xff] }
   0x3   :  { %971 = vmatpush3.msra.mxu1 %v24_v2  ;;  %972 = vmatprep.mubr.msk.f32.mxu1 %vm1028_vm1, %v1027_v0  ;;  %v13_v7 = vld [vmem:[%s1213_s0 + $0x4] sm:$0x3]  ;;  %v14_v8 = vld [vmem:[%s1213_s0 + $0x6] sm:$0x3]  ;;  %v28_v10 = vld [vmem:[%s1212_s1 + $0x28] sm:$0xff] }
   0x4   :  { %968 = vmatmul.mubr.msk.f32.vlgmr.msra.gmra.mxu0 %vm35_vm0, %v11_v3  ;;  %973 = vmatmul.mubr.msk.f32.vlgmr.msra.gmra.mxu1 %vm35_vm0, %v12_v4  ;;  %v27_v9 = vld [vmem:[%s1212_s1 + $0x20] sm:$0xff]  ;;  %v15_v11 = vld [vmem:[%s1213_s0 + $0x8] sm:$0x3]  ;;  %v16_v12 = vld [vmem:[%s1213_s0 + $0xa] sm:$0x3] }
   0x5   :  { %975 = vmatprep.subr.mxu0 %v1027_v0  ;;  %980 = vmatprep.subr.mxu1 %v1027_v0  ;;  %v29_v13 = vld [vmem:[%s1212_s1 + $0x30] sm:$0xff]  ;;  %v30_v14 = vld [vmem:[%s1212_s1 + $0x38] sm:$0xff]  ;;  %v17_v15 = vld [vmem:[%s1213_s0 + $0xc] sm:$0x3] }
   0x6   :  { %976 = vmatpush3.msra.mxu0 %v25_v5  ;;  %981 = vmatpush3.msra.mxu1 %v26_v6  ;;  %v18_v16 = vld [vmem:[%s1213_s0 + $0xe] sm:$0x3]  ;;  %v31_v17 = vld [vmem:[%s1212_s1 + $0x40] sm:$0xff]  ;;  %v19_v19 = vld [vmem:[%s1213_s0 + $0x10] sm:$0x3] }
   0x7   :  { %977 = vmatprep.mubr.msk.f32.mxu0 %vm1028_vm1, %v1027_v0  ;;  %982 = vmatprep.mubr.msk.f32.mxu1 %vm1028_vm1, %v1027_v0  ;;  %v32_v18 = vld [vmem:[%s1212_s1 + $0x48] sm:$0xff]  ;;  %v20_v20 = vld [vmem:[%s1213_s0 + $0x12] sm:$0x3]  ;;  %v34_v22 = vld [vmem:[%s1212_s1 + $0x58] sm:$0xff] }
   0x8   :  { %978 = vmatmul.mubr.msk.f32.vlgmr.msra.gmra.mxu0 %vm35_vm0, %v13_v7  ;;  %983 = vmatmul.mubr.msk.f32.vlgmr.msra.gmra.mxu1 %vm35_vm0, %v14_v8  ;;  %v33_v21 = vld [vmem:[%s1212_s1 + $0x50] sm:$0xff] }
   0x9   :  { %985 = vmatprep.subr.mxu0 %v1027_v0  ;;  %990 = vmatprep.subr.mxu1 %v1027_v0  ;;  %v21_v23 = vld [vmem:[%s1213_s0 + $0x14] sm:$0x3]  ;;  %v22_v24 = vld [vmem:[%s1213_s0 + $0x16] sm:$0x3] }
   0xa   :  { %986 = vmatpush3.msra.mxu0 %v27_v9  ;;  %991 = vmatpush3.msra.mxu1 %v28_v10 }
   0xb   :  { %987 = vmatprep.mubr.msk.f32.mxu0 %vm1028_vm1, %v1027_v0  ;;  %992 = vmatprep.mubr.msk.f32.mxu1 %vm1028_vm1, %v1027_v0 }
   0xc   :  { %988 = vmatmul.mubr.msk.f32.vlgmr.msra.gmra.mxu0 %vm35_vm0, %v15_v11  ;;  %993 = vmatmul.mubr.msk.f32.vlgmr.msra.gmra.mxu1 %vm35_vm0, %v16_v12 }
   0xd   :  { %995 = vmatprep.subr.mxu0 %v1027_v0  ;;  %1000 = vmatprep.subr.mxu1 %v1027_v0 }
   0xe   :  { %996 = vmatpush3.msra.mxu0 %v29_v13  ;;  %1001 = vmatpush3.msra.mxu1 %v30_v14 }
   0xf   :  { %997 = vmatprep.mubr.msk.f32.mxu0 %vm1028_vm1, %v1027_v0  ;;  %1002 = vmatprep.mubr.msk.f32.mxu1 %vm1028_vm1, %v1027_v0 }
  0x10   :  { %998 = vmatmul.mubr.msk.f32.vlgmr.msra.gmra.mxu0 %vm35_vm0, %v17_v15  ;;  %1003 = vmatmul.mubr.msk.f32.vlgmr.msra.gmra.mxu1 %vm35_vm0, %v18_v16 }
  0x11   :  { %1005 = vmatprep.subr.mxu0 %v1027_v0  ;;  %1010 = vmatprep.subr.mxu1 %v1027_v0 }
  0x12   :  { %1006 = vmatpush3.msra.mxu0 %v31_v17  ;;  %1011 = vmatpush3.msra.mxu1 %v32_v18 }
  0x13   :  { %1007 = vmatprep.mubr.msk.f32.mxu0 %vm1028_vm1, %v1027_v0  ;;  %1012 = vmatprep.mubr.msk.f32.mxu1 %vm1028_vm1, %v1027_v0 }
  0x14   :  { %1008 = vmatmul.mubr.msk.f32.vlgmr.msra.gmra.mxu0 %vm35_vm0, %v19_v19  ;;  %1013 = vmatmul.mubr.msk.f32.vlgmr.msra.gmra.mxu1 %vm35_vm0, %v20_v20 }
  0x15   :  { %1015 = vmatprep.subr.mxu0 %v1027_v0  ;;  %1020 = vmatprep.subr.mxu1 %v1027_v0 }
  0x16   :  { %1016 = vmatpush3.msra.mxu0 %v33_v21  ;;  %1021 = vmatpush3.msra.mxu1 %v34_v22 }
  0x17   :  { %1017 = vmatprep.mubr.msk.f32.mxu0 %vm1028_vm1, %v1027_v0  ;;  %1022 = vmatprep.mubr.msk.f32.mxu1 %vm1028_vm1, %v1027_v0 }
  0x18   :  { %1018 = vmatmul.mubr.msk.f32.vlgmr.msra.gmra.mxu0 %vm35_vm0, %v21_v23  ;;  %1023 = vmatmul.mubr.msk.f32.vlgmr.msra.gmra.mxu1 %vm35_vm0, %v22_v24 }
  0xc4   :  { %v105_v25 = vpop.f32.mrf.mxu0  ;;  %v178_v26 = vpop.f32.mrf.mxu1 }
  0xc5   :  { %913 = vst.msk [vmem:[%s1214_s2] sm:$0x3] %vm912_vm2, %v105_v25  ;;  %914 = vst.msk [vmem:[%s1214_s2 + $0x2] sm:$0x3] %vm912_vm2, %v178_v26 }
  0xc6   :  { %v969_v27 = vpop.f32.mrf.mxu0  ;;  %v974_v28 = vpop.f32.mrf.mxu1 }
  0xc8   :  { %v251_v29 = vpop.f32.mrf.mxu0  ;;  %v324_v30 = vpop.f32.mrf.mxu1 }
  0xc9   :  { %915 = vst.msk [vmem:[%s1214_s2 + $0x4] sm:$0x3] %vm912_vm2, %v251_v29  ;;  %916 = vst.msk [vmem:[%s1214_s2 + $0x6] sm:$0x3] %vm912_vm2, %v324_v30 }
  0xca   :  { %v979_v31 = vpop.f32.mrf.mxu0  ;;  %v984_v32 = vpop.f32.mrf.mxu1 }
  0xcc   :  { %v397_v33 = vpop.f32.mrf.mxu0  ;;  %v470_v34 = vpop.f32.mrf.mxu1 }
  0xcd   :  { %917 = vst.msk [vmem:[%s1214_s2 + $0x8] sm:$0x3] %vm912_vm2, %v397_v33  ;;  %918 = vst.msk [vmem:[%s1214_s2 + $0xa] sm:$0x3] %vm912_vm2, %v470_v34 }
  0xce   :  { %v989_v35 = vpop.f32.mrf.mxu0  ;;  %v994_v36 = vpop.f32.mrf.mxu1 }
  0xd0   :  { %v543_v37 = vpop.f32.mrf.mxu0  ;;  %v616_v38 = vpop.f32.mrf.mxu1 }
  0xd1   :  { %919 = vst.msk [vmem:[%s1214_s2 + $0xc] sm:$0x3] %vm912_vm2, %v543_v37  ;;  %920 = vst.msk [vmem:[%s1214_s2 + $0xe] sm:$0x3] %vm912_vm2, %v616_v38 }
  0xd2   :  { %v999_v39 = vpop.f32.mrf.mxu0  ;;  %v1004_v40 = vpop.f32.mrf.mxu1 }
  0xd4   :  { %v689_v41 = vpop.f32.mrf.mxu0  ;;  %v762_v42 = vpop.f32.mrf.mxu1 }
  0xd5   :  { %921 = vst.msk [vmem:[%s1214_s2 + $0x10] sm:$0x3] %vm912_vm2, %v689_v41  ;;  %922 = vst.msk [vmem:[%s1214_s2 + $0x12] sm:$0x3] %vm912_vm2, %v762_v42 }
  0xd6   :  { %v1009_v43 = vpop.f32.mrf.mxu0  ;;  %v1014_v44 = vpop.f32.mrf.mxu1 }
  0xd8   :  { %v835_v45 = vpop.f32.mrf.mxu0  ;;  %v908_v46 = vpop.f32.mrf.mxu1 }
  0xd9   :  { %923 = vst.msk [vmem:[%s1214_s2 + $0x14] sm:$0x3] %vm912_vm2, %v835_v45  ;;  %924 = vst.msk [vmem:[%s1214_s2 + $0x16] sm:$0x3] %vm912_vm2, %v908_v46 }
  0xda   :  { %v1019_v47 = vpop.f32.mrf.mxu0  ;;  %v1024_v48 = vpop.f32.mrf.mxu1 }

</bundles_post_ra>
